<compile_context>
chip_gen: v5e
topology: v5e:2x2
jax: 0.10.0
libtpu: 0.0.40
codegen_flags: <defaults>
</compile_context>

<pallas_src>
import functools

import jax
import jax.numpy as jnp
from jax.experimental import pallas as pl
from jax.experimental.pallas import tpu as pltpu

_SUBLANE = 8  # f32 sublane count (second-to-last vreg dim)


def _round_up(v, m):
    return ((v + m - 1) // m) * m


def _vmem_capacity_bytes():
    """Per-core VMEM capacity; conservative 64 MiB fallback (v7x-safe)."""
    try:
        return int(pltpu.get_tpu_info().vmem_capacity_bytes)
    except Exception:  # pragma: no cover - query unavailable
        return 64 * 1024 * 1024


def _pick_tm(n_rows, c, h, x_bytes, w_bytes, out_bytes, budget_bytes, tm_cap):
    """Largest row tile fitting the VMEM budget, with >=4 grid steps when possible."""
    # Both weight slabs stay resident; the default pipeline double-buffers them.
    weight_bytes = 2 * (2 * c * h) * w_bytes
    per_row = (
        2 * c * x_bytes        # x tile (native dtype), double-buffered
        + 2 * c * out_bytes    # out tile, double-buffered
        + 4 * (c + h)          # f32 intermediates h and y in the body
        + w_bytes * (c + h)    # compute-dtype casts of the x row / h row
    )
    avail = int(budget_bytes * 0.8) - weight_bytes   # margin for Mosaic scratch
    tm = (max(avail, 0) // per_row) // _SUBLANE * _SUBLANE
    tm = max(tm, _SUBLANE)
    tm = min(tm, tm_cap)
    # >= 4 grid steps (2 tiles per TC on v7x; pipelined overlap on 1-TC parts),
    # but keep tiles >= 512 rows so each step stays near the HBM roofline.
    quarter_rows = _round_up(pl.cdiv(n_rows, 4), _SUBLANE)
    tm = min(tm, max(quarter_rows, 512))
    # Never exceed the (sublane-rounded) row count.
    tm = min(tm, _round_up(n_rows, _SUBLANE))
    return max(tm, _SUBLANE)


def _adapter_kernel(x_ref, w1t_ref, w2t_ref, o_ref, *, compute_dtype):
    # x_ref:   (tm, C)  input rows in their native dtype
    # w1t_ref: (C, H)   = W1^T  (W1: (H, C)), already in compute dtype
    # w2t_ref: (H, C)   = W2^T  (W2: (C, H)), already in compute dtype
    x = x_ref[...].astype(compute_dtype)               # in-kernel cast (VPU filler)
    h = jnp.dot(x, w1t_ref[...], preferred_element_type=jnp.float32)
    h = jnp.maximum(h, 0.0).astype(compute_dtype)      # ReLU, back to MXU operand dtype
    y = jnp.dot(h, w2t_ref[...], preferred_element_type=jnp.float32)
    o_ref[...] = jnp.maximum(y, 0.0).astype(o_ref.dtype)


def adapter_forward(x, w1, w2, *, tm=None, compute_dtype=jnp.bfloat16,
                    out_dtype=None, vmem_budget_bytes=None):
    """relu(relu(x @ w1.T) @ w2.T) with PyTorch nn.Linear weight layout.

    x: [N, C] ; w1: [H, C] ; w2: [C, H].
    compute_dtype: MXU operand dtype (default bf16); accumulation is f32.
    out_dtype: output dtype (default: x.dtype).
    """
    N, C = x.shape
    H = w1.shape[0]
    assert w1.shape == (H, C) and w2.shape == (C, H)

    out_dtype = x.dtype if out_dtype is None else jnp.dtype(out_dtype)
    compute_dtype = jnp.dtype(compute_dtype)
    x_b = jnp.dtype(x.dtype).itemsize
    w_b = compute_dtype.itemsize
    o_b = out_dtype.itemsize

    # Generation-aware VMEM sizing: budget (for tm) <= compile limit <= capacity.
    cap = _vmem_capacity_bytes()
    if vmem_budget_bytes is None:
        vmem_budget_bytes = cap // 2                       # 32 MiB v7x, 64 MiB v5e/v6e
    vmem_limit_bytes = max(cap * 3 // 4, vmem_budget_bytes + (8 << 20))
    vmem_limit_bytes = min(vmem_limit_bytes, 128 * 1024 * 1024)
    tm_cap = 2048 if cap >= 100 * 1024 * 1024 else 1024    # lift cap on 128-MiB parts

    if tm is None:
        tm = _pick_tm(N, C, H, x_b, w_b, o_b, vmem_budget_bytes, tm_cap)
    tm = max(_round_up(tm, _SUBLANE), _SUBLANE)

    # Weights are tiny relative to x traffic: transpose + cast once in the wrapper.
    w1t = jnp.asarray(w1.T, dtype=compute_dtype)   # (C, H)
    w2t = jnp.asarray(w2.T, dtype=compute_dtype)   # (H, C)

    grid = (pl.cdiv(N, tm),)                       # partial last tile handled by Pallas
    kernel = functools.partial(_adapter_kernel, compute_dtype=compute_dtype)

    cost = pl.CostEstimate(
        flops=4 * N * C * H,                       # two matmuls, 2*N*C*H each
        transcendentals=0,
        bytes_accessed=N * C * x_b + 2 * C * H * w_b + N * C * o_b,
    )

    return pl.pallas_call(
        kernel,
        out_shape=jax.ShapeDtypeStruct((N, C), out_dtype),
        grid=grid,
        in_specs=[
            pl.BlockSpec((tm, C), lambda i: (i, 0)),   # x row tile (native dtype)
            pl.BlockSpec((C, H), lambda i: (0, 0)),    # W1^T, VMEM-resident
            pl.BlockSpec((H, C), lambda i: (0, 0)),    # W2^T, VMEM-resident
        ],
        out_specs=pl.BlockSpec((tm, C), lambda i: (i, 0)),
        compiler_params=pltpu.CompilerParams(
            dimension_semantics=("parallel",),          # row tiles independent
            vmem_limit_bytes=int(vmem_limit_bytes),
        ),
        cost_estimate=cost,
    )(x, w1t, w2t)


def adapter_reference(x, w1, w2):
    h = jnp.maximum(x @ w1.T, 0.0)
    return jnp.maximum(h @ w2.T, 0.0)


if __name__ == "__main__":
    # Small shapes consistent with Adapter(c_in=32, reduction=4).
    # (At this size the kernel is pure fixed overhead; it exists to exercise
    #  the production path, which targets c_in=512/1024 and large N.)
    N = 8
    C_IN = 32
    REDUCTION = 4
    HID = C_IN // REDUCTION  # 8

    key = jax.random.PRNGKey(0)
    kx, kw1, kw2 = jax.random.split(key, 3)

    x = jax.random.normal(kx, (N, C_IN), dtype=jnp.float32)
    # PyTorch nn.Linear weight layout: (out_features, in_features)
    w1 = jax.random.normal(kw1, (HID, C_IN), dtype=jnp.float32) * 0.1
    w2 = jax.random.normal(kw2, (C_IN, HID), dtype=jnp.float32) * 0.1

    ref = adapter_reference(x, w1, w2)

    # Exact f32 operand path.
    out_f32 = jax.block_until_ready(
        adapter_forward(x, w1, w2, compute_dtype=jnp.float32))
    assert out_f32.shape == (N, C_IN) and out_f32.dtype == x.dtype
    assert jnp.allclose(out_f32, ref, atol=1e-5, rtol=1e-5)

    # Default path: bf16 operands / f32 MXU accumulation (recommended on v5e-v7x).
    out_bf16 = jax.block_until_ready(adapter_forward(x, w1, w2))
    assert out_bf16.shape == (N, C_IN) and out_bf16.dtype == x.dtype
    assert jnp.allclose(out_bf16, ref, atol=3e-2, rtol=3e-2)

    print("KERNEL_OK")
</pallas_src>

<mosaic_0001>
module attributes {stable_mosaic.version = 11 : i64} {
  func.func @_adapter_kernel(%arg0: i32, %arg1: memref<8x32xf32, #tpu.memory_space<vmem>>, %arg2: memref<32x8xf32, #tpu.memory_space<vmem>>, %arg3: memref<8x32xf32, #tpu.memory_space<vmem>>, %arg4: memref<8x32xf32, #tpu.memory_space<vmem>>) attributes {dimension_semantics = [#tpu.dimension_semantics<parallel>], iteration_bounds = array<i64: 1>, scalar_prefetch = 0 : i64, scratch_operands = 0 : i64, tpu.core_type = #tpu.core_type<tc>, window_params = [{transform_indices = @transform_0, window_bounds = array<i64: 8, 32>}, {pipeline_mode = #tpu.pipeline_mode<synchronous>, transform_indices = @transform_1, window_bounds = array<i64: 32, 8>}, {pipeline_mode = #tpu.pipeline_mode<synchronous>, transform_indices = @transform_2, window_bounds = array<i64: 8, 32>}, {transform_indices = @transform_3, window_bounds = array<i64: 8, 32>}]} {
    %c0 = arith.constant 0 : index
    %c0_0 = arith.constant 0 : index
    %0 = vector.load %arg1[%c0, %c0_0] : memref<8x32xf32, #tpu.memory_space<vmem>>, vector<8x32xf32>
    %c0_1 = arith.constant 0 : index
    %c0_2 = arith.constant 0 : index
    %1 = vector.load %arg2[%c0_1, %c0_2] : memref<32x8xf32, #tpu.memory_space<vmem>>, vector<32x8xf32>
    %cst = arith.constant dense<0.000000e+00> : vector<8x8xf32>
    %2 = tpu.matmul %0, %1, %cst {dimension_numbers = #tpu.dot_dimension_numbers<[1], [0], [0], [1], [0, 0, 1, 1], [], []>} : vector<8x32xf32>, vector<32x8xf32>, vector<8x8xf32> -> vector<8x8xf32>
    %cst_3 = arith.constant 0.000000e+00 : f32
    %3 = vector.broadcast %cst_3 : f32 to vector<8x8xf32>
    %4 = arith.maximumf %2, %3 : vector<8x8xf32>
    %c0_4 = arith.constant 0 : index
    %c0_5 = arith.constant 0 : index
    %5 = vector.load %arg3[%c0_4, %c0_5] : memref<8x32xf32, #tpu.memory_space<vmem>>, vector<8x32xf32>
    %cst_6 = arith.constant dense<0.000000e+00> : vector<8x32xf32>
    %6 = tpu.matmul %4, %5, %cst_6 {dimension_numbers = #tpu.dot_dimension_numbers<[1], [0], [0], [1], [0, 0, 1, 1], [], []>} : vector<8x8xf32>, vector<8x32xf32>, vector<8x32xf32> -> vector<8x32xf32>
    %cst_7 = arith.constant 0.000000e+00 : f32
    %7 = vector.broadcast %cst_7 : f32 to vector<8x32xf32>
    %8 = arith.maximumf %6, %7 : vector<8x32xf32>
    %c0_8 = arith.constant 0 : index
    %c0_9 = arith.constant 0 : index
    %9 = vector.load %arg4[%c0_8, %c0_9] : memref<8x32xf32, #tpu.memory_space<vmem>>, vector<8x32xf32>
    tpu.vector_store %arg4[%c0_8, %c0_9], %8 {strides = array<i32>} : memref<8x32xf32, #tpu.memory_space<vmem>>, vector<8x32xf32>,
    return
  }
  func.func @transform_0(%arg0: i32) -> (i32, i32) {
    %c0_i32 = arith.constant 0 : i32
    %c0_i32_0 = arith.constant 0 : i32
    return %arg0, %c0_i32 : i32, i32
  }
  func.func @transform_1(%arg0: i32) -> (i32, i32) {
    %c0_i32 = arith.constant 0 : i32
    %c0_i32_0 = arith.constant 0 : i32
    %c0_i32_1 = arith.constant 0 : i32
    return %c0_i32, %c0_i32_0 : i32, i32
  }
  func.func @transform_2(%arg0: i32) -> (i32, i32) {
    %c0_i32 = arith.constant 0 : i32
    %c0_i32_0 = arith.constant 0 : i32
    %c0_i32_1 = arith.constant 0 : i32
    return %c0_i32, %c0_i32_0 : i32, i32
  }
  func.func @transform_3(%arg0: i32) -> (i32, i32) {
    %c0_i32 = arith.constant 0 : i32
    %c0_i32_0 = arith.constant 0 : i32
    return %arg0, %c0_i32 : i32, i32
  }
}

</mosaic_0001>

<bundles_post_ra>
// kernel: tpu_custom_call.1
= control target key start
LH: loop header
LB: loop body
LE: loop exit
PB: predicated region body
PF: predicated region fallthrough
CT: control target
= control target key end

     0   :  { %s161_s0 = inlined_call_operand.vmem [shape: f32[8,32], index: 0, kind: input, shape index: {}]   ;;  %s162_s1 = inlined_call_operand.vmem [shape: f32[32,8], index: 1, kind: input, shape index: {}]   ;;  %s163_s2 = inlined_call_operand.vmem [shape: f32[8,32], index: 2, kind: input, shape index: {}]   ;;  %s164_s3 = inlined_call_operand.hbm [shape: f32[8,32], index: 3, kind: output, shape index: {}]  }
   0x1   :  { %v19_v0 = vld [vmem:[%s162_s1 + $0x18] sm:$0xff]  ;;  %v18_v1 = vld [vmem:[%s162_s1 + $0x10] sm:$0xff] }
   0x2   :  { %36 = vmatpush.msra.mxu0 %v19_v0 }
   0x3   :  { %8 = vsyncpa [#allocation3], 0  ;;  %v17_v2 = vld [vmem:[%s162_s1 + $0x8] sm:$0xff]  ;;  %v16_v3 = vld [vmem:[%s162_s1] sm:$0xff]  ;;  %vm20_vm0 = vcmask 261120   ;;  %vm46_vm1 = vcmask 64512  }
   0x4   :  { %37 = vmatpush.msra.mxu0 %v18_v1  ;;  %v15_v4 = vld [vmem:[%s161_s0] sm:$0xff]  ;;  %s117_s24 = smov [#allocation2]   ;;  %s79_s27 = sshll.u32 %s164_s3, 4  ;;  %s80_s27 = int_to_ptr.hbm [resolvable:$true] %s79_s27 }
   0x5   :  { %v45_v5 = vld [vmem:[%s163_s2] sm:$0xff]  ;;  %s77_s1 = sshll.u32 %s117_s24, 4  ;;  %s78_s1 = int_to_ptr.vmem [resolvable:$true] %s77_s1 }
   0x6   :  { %38 = vmatpush.msra.mxu0 %v17_v2  ;;  %65 = vmatpush.msra.mxu1 %v45_v5 }
   0x8   :  { %39 = vmatpush.msra.mxu0 %v16_v3 }
   0x9   :  { %88 = vmatmul.msk.f32.vlgmr.msra.gmra.mxu0 %vm20_vm0, %v15_v4 }
  0x86   :  { %v41_v6 = vpop.f32.mrf.mxu0 }
  0x87   :  { %v44_v7 = vmax.f32 %v41_v6, 0.0 }
  0x89   :  { %89 = vmatmul.msk.f32.vlgmr.msra.gmra.mxu1 %vm46_vm1, %v44_v7 }
 0x106   :  { %v67_v8 = vpop.f32.mrf.mxu1 }
 0x107   :  { %v70_v9 = vmax.f32 %v67_v8, 0.0 }
 0x109   :  { %71 = vst.msk [vmem:[#allocation2] sm:$0xff] %vm20_vm0, %v70_v9 }
 0x10a   :  { %82 = dma.vmem_to_hbm [thread:$0]  %s78_s1, 128, %s80_s27, [#allocation3]  }
 0x10b   :  { %115 = dma.done.wait [#allocation3], 128  }
 0x10c   :  { %116 = vsyncadd [#allocation3], 4294967168 }
 0x10d   :  { %87 = vsyncpa [#allocation3], 1 }

</bundles_post_ra>
